<compile_context>
chip_gen: v7x
topology: tpu7x:2x2x1
jax: 0.10.0
libtpu: 0.0.40
codegen_flags: <defaults>
</compile_context>

<pallas_src>
import math
import functools

import jax
import jax.numpy as jnp
from jax import lax
from jax.experimental import pallas as pl
from jax.experimental.pallas import tpu as pltpu

_LANES = 128
_MAX_BLOCK_ROWS = 1024   # (1024, 128) f32 = 512 KiB per pipeline buffer


def _dr_loss_kernel(np_ref, nn_ref, pos_ref, neg_ref, out_ref,
                    m_sc, s_sc, a_sc, *,
                    inv_pos_lambda, inv_neg_lambda, L, tau_over_L, margin,
                    neg_block_elems):
    i = pl.program_id(0)
    neg_inf = jnp.float32(-jnp.inf)

    @pl.when(i == 0)
    def _init():
        m_sc[...] = jnp.full((1, 1), -jnp.inf, jnp.float32)
        s_sc[...] = jnp.zeros((1, 1), jnp.float32)
        a_sc[...] = jnp.zeros((1, 1), jnp.float32)

    # ---- online softmax-weighted-sum over this block of negatives ---------
    x = neg_ref[...].astype(jnp.float32)
    r, c = x.shape
    lin = (lax.broadcasted_iota(jnp.int32, (r, c), 0) * c
           + lax.broadcasted_iota(jnp.int32, (r, c), 1))
    remaining = nn_ref[0] - i * neg_block_elems       # valid elems in this block
    valid = lin < remaining
    z = jnp.where(valid, x * jnp.float32(inv_neg_lambda), neg_inf)

    m_prev = m_sc[...]                                 # (1,1)
    m_new = jnp.maximum(m_prev, jnp.max(z, keepdims=True))
    alpha = jnp.exp(m_prev - m_new)                    # 0.0 on the first block
    e = jnp.where(valid, jnp.exp(z - m_new), jnp.float32(0.0))
    s_sc[...] = s_sc[...] * alpha + jnp.sum(e, keepdims=True)
    a_sc[...] = a_sc[...] * alpha + jnp.sum(e * x, keepdims=True)
    m_sc[...] = m_new

    # ---- finalize: positive softmax + scalar loss --------------------------
    @pl.when(i == pl.num_programs(0) - 1)
    def _finalize():
        # Exact division (NOT approx reciprocal) — the ~1e-3 relative error of
        # the approximate reciprocal was amplified by tau*sigmoid(arg) ~= 4.
        neg_dist = a_sc[...] / s_sc[...]               # (1,1)

        p = pos_ref[...].astype(jnp.float32)
        pr, pc = p.shape
        plin = (lax.broadcasted_iota(jnp.int32, (pr, pc), 0) * pc
                + lax.broadcasted_iota(jnp.int32, (pr, pc), 1))
        pvalid = plin < np_ref[0]
        zp = jnp.where(pvalid, -p * jnp.float32(inv_pos_lambda), neg_inf)
        mp = jnp.max(zp, keepdims=True)
        ep = jnp.where(pvalid, jnp.exp(zp - mp), jnp.float32(0.0))
        pos_dist = (jnp.sum(ep * p, keepdims=True)
                    / jnp.sum(ep, keepdims=True))

        arg = jnp.float32(L) * (neg_dist - pos_dist + jnp.float32(margin))
        out_ref[...] = jnp.float32(tau_over_L) * jnp.log(1.0 + jnp.exp(arg))


def _sublane_multiple(dtype):
    # 8 rows for f32, 16 for bf16, 32 for int8 — keeps blocks tile-aligned.
    return max(8, 32 // jnp.dtype(dtype).itemsize)


def _pad_to_rows(x, rows):
    n = int(x.shape[0])
    return jnp.pad(x, (0, rows * _LANES - n)).reshape(rows, _LANES)


def sigmoid_dr_loss(pos_prob, neg_prob,
                    pos_lambda=1.0,
                    neg_lambda=0.1 / math.log(3.5),
                    L=6.0, tau=4.0, margin=0.5):
    """Pallas implementation of SigmoidDRLoss.forward. Returns a scalar f32."""
    # Static empty-input branches (shapes are static in JAX):
    #   * empty pos -> pos_dist = 1.0 (PyTorch else-branch); a single 1.0
    #     element reproduces it exactly (softmax over one element = 1).
    #   * empty neg -> neg_dist = 0.0 (sum over empty); a single 0.0 element
    #     reproduces it exactly.
    if int(pos_prob.shape[0]) == 0:
        pos_prob = jnp.ones((1,), jnp.float32)
    if int(neg_prob.shape[0]) == 0:
        neg_prob = jnp.zeros((1,), jnp.float32)

    np_, nn_ = int(pos_prob.shape[0]), int(neg_prob.shape[0])

    # Positives: one small resident lane-dense tile.
    pmul = _sublane_multiple(pos_prob.dtype)
    pos_rows = max(pmul, pmul * math.ceil(np_ / (pmul * _LANES)))
    pos_t = _pad_to_rows(pos_prob, pos_rows)

    # Negatives: streamed in (block_rows, 128) tiles over a 1-D grid.
    nmul = _sublane_multiple(neg_prob.dtype)
    rows0 = max(nmul, nmul * math.ceil(nn_ / (nmul * _LANES)))
    block_rows = min(_MAX_BLOCK_ROWS, rows0)
    n_blocks = math.ceil(rows0 / block_rows)
    neg_t = _pad_to_rows(neg_prob, n_blocks * block_rows)

    np_count = jnp.asarray([np_], jnp.int32)
    nn_count = jnp.asarray([nn_], jnp.int32)

    kernel = functools.partial(
        _dr_loss_kernel,
        inv_pos_lambda=1.0 / float(pos_lambda),
        inv_neg_lambda=1.0 / float(neg_lambda),
        L=float(L), tau_over_L=float(tau) / float(L), margin=float(margin),
        neg_block_elems=block_rows * _LANES)

    grid_spec = pltpu.PrefetchScalarGridSpec(
        num_scalar_prefetch=2,
        grid=(n_blocks,),
        in_specs=[
            pl.BlockSpec((pos_rows, _LANES), lambda i, npc, nnc: (0, 0)),
            pl.BlockSpec((block_rows, _LANES), lambda i, npc, nnc: (i, 0)),
        ],
        out_specs=pl.BlockSpec((1, 1), lambda i, npc, nnc: (0, 0)),
        scratch_shapes=[pltpu.VMEM((1, 1), jnp.float32),
                        pltpu.VMEM((1, 1), jnp.float32),
                        pltpu.VMEM((1, 1), jnp.float32)],
    )

    out = pl.pallas_call(
        kernel,
        out_shape=jax.ShapeDtypeStruct((1, 1), jnp.float32),
        grid_spec=grid_spec,
        compiler_params=pltpu.CompilerParams(
            dimension_semantics=("arbitrary",)),
    )(np_count, nn_count, pos_t, neg_t)
    return out[0, 0]


def _reference(pos_prob, neg_prob,
               pos_lambda=1.0, neg_lambda=0.1 / math.log(3.5),
               L=6.0, tau=4.0, margin=0.5):
    neg_q = jax.nn.softmax(neg_prob / neg_lambda, axis=0)
    neg_dist = jnp.sum(neg_q * neg_prob)
    if int(pos_prob.shape[0]) > 0:
        pos_q = jax.nn.softmax(-pos_prob / pos_lambda, axis=0)
        pos_dist = jnp.sum(pos_q * pos_prob)
    else:
        pos_dist = jnp.float32(1.0)
    return tau * jnp.log(1.0 + jnp.exp(L * (neg_dist - pos_dist + margin))) / L


if __name__ == "__main__":
    key = jax.random.PRNGKey(0)
    k1, k2, k3, k4 = jax.random.split(key, 4)

    # Small case consistent with the module (sigmoid scores in [0, 1]).
    pos_prob = jax.random.uniform(k1, (37,), jnp.float32)
    neg_prob = jax.random.uniform(k2, (500,), jnp.float32)
    loss = jax.block_until_ready(sigmoid_dr_loss(pos_prob, neg_prob))
    ref = _reference(pos_prob, neg_prob)
    assert jnp.allclose(loss, ref, rtol=1e-4, atol=1e-5), (loss, ref)

    # Empty-positive branch (static-shape decision).
    loss_e = jax.block_until_ready(
        sigmoid_dr_loss(jnp.zeros((0,), jnp.float32), neg_prob))
    ref_e = _reference(jnp.zeros((0,), jnp.float32), neg_prob)
    assert jnp.allclose(loss_e, ref_e, rtol=1e-4, atol=1e-5), (loss_e, ref_e)

    # Larger negatives: exercises the multi-block online-softmax pipeline
    # (2 grid steps of (1024, 128) with a masked tail tile).
    pos_big = jax.random.uniform(k3, (64,), jnp.float32)
    neg_big = jax.random.uniform(k4, (200_000,), jnp.float32)
    loss_b = jax.block_until_ready(sigmoid_dr_loss(pos_big, neg_big))
    ref_b = _reference(pos_big, neg_big)
    assert jnp.allclose(loss_b, ref_b, rtol=1e-4, atol=1e-5), (loss_b, ref_b)

    print("KERNEL_OK")
</pallas_src>

<mosaic_0001>
module attributes {stable_mosaic.version = 11 : i64} {
  func.func @_dr_loss_kernel(%arg0: i32, %arg1: memref<1xi32, #tpu.memory_space<smem>>, %arg2: memref<1xi32, #tpu.memory_space<smem>>, %arg3: memref<8x128xf32, #tpu.memory_space<vmem>>, %arg4: memref<8x128xf32, #tpu.memory_space<vmem>>, %arg5: memref<1x1xf32, #tpu.memory_space<vmem>>, %arg6: memref<1x1xf32, #tpu.memory_space<vmem>>, %arg7: memref<1x1xf32, #tpu.memory_space<vmem>>, %arg8: memref<1x1xf32, #tpu.memory_space<vmem>>) attributes {dimension_semantics = [#tpu.dimension_semantics<arbitrary>], iteration_bounds = array<i64: 1>, scalar_prefetch = 2 : i64, scratch_operands = 3 : i64, tpu.core_type = #tpu.core_type<tc>, window_params = [{pipeline_mode = #tpu.pipeline_mode<synchronous>, transform_indices = @transform_0, window_bounds = array<i64: 8, 128>}, {transform_indices = @transform_1, window_bounds = array<i64: 8, 128>}, {pipeline_mode = #tpu.pipeline_mode<synchronous>, transform_indices = @transform_2, window_bounds = array<i64: 1, 1>}]} {
    %c0_i32 = arith.constant 0 : i32
    %0 = arith.cmpi eq, %arg0, %c0_i32 : i32
    %1 = arith.extui %0 : i1 to i32
    %c0_i32_0 = arith.constant 0 : i32
    %2 = arith.cmpi ne, %1, %c0_i32_0 : i32
    scf.if %2 {
      %cst_23 = arith.constant 0xFF800000 : f32
      %55 = vector.broadcast %cst_23 : f32 to vector<1x1xf32>
      %c0_24 = arith.constant 0 : index
      %c0_25 = arith.constant 0 : index
      %56 = vector.load %arg6[%c0_24, %c0_25] : memref<1x1xf32, #tpu.memory_space<vmem>>, vector<1x1xf32>
      tpu.vector_store %arg6[%c0_24, %c0_25], %55 {strides = array<i32>} : memref<1x1xf32, #tpu.memory_space<vmem>>, vector<1x1xf32>,
      %cst_26 = arith.constant 0.000000e+00 : f32
      %57 = vector.broadcast %cst_26 : f32 to vector<1x1xf32>
      %c0_27 = arith.constant 0 : index
      %c0_28 = arith.constant 0 : index
      %58 = vector.load %arg7[%c0_27, %c0_28] : memref<1x1xf32, #tpu.memory_space<vmem>>, vector<1x1xf32>
      tpu.vector_store %arg7[%c0_27, %c0_28], %57 {strides = array<i32>} : memref<1x1xf32, #tpu.memory_space<vmem>>, vector<1x1xf32>,
      %cst_29 = arith.constant 0.000000e+00 : f32
      %59 = vector.broadcast %cst_29 : f32 to vector<1x1xf32>
      %c0_30 = arith.constant 0 : index
      %c0_31 = arith.constant 0 : index
      %60 = vector.load %arg8[%c0_30, %c0_31] : memref<1x1xf32, #tpu.memory_space<vmem>>, vector<1x1xf32>
      tpu.vector_store %arg8[%c0_30, %c0_31], %59 {strides = array<i32>} : memref<1x1xf32, #tpu.memory_space<vmem>>, vector<1x1xf32>,
    } else {
    }
    %c0 = arith.constant 0 : index
    %c0_1 = arith.constant 0 : index
    %3 = vector.load %arg4[%c0, %c0_1] : memref<8x128xf32, #tpu.memory_space<vmem>>, vector<8x128xf32>
    %4 = tpu.iota {dimensions = array<i32: 0>} : vector<8x128xi32>
    %c128_i32 = arith.constant 128 : i32
    %5 = vector.broadcast %c128_i32 : i32 to vector<8x128xi32>
    %6 = arith.muli %4, %5 : vector<8x128xi32>
    %7 = tpu.iota {dimensions = array<i32: 1>} : vector<8x128xi32>
    %8 = arith.addi %6, %7 : vector<8x128xi32>
    %c0_2 = arith.constant 0 : index
    %9 = memref.load %arg2[%c0_2] : memref<1xi32, #tpu.memory_space<smem>>
    %c1024_i32 = arith.constant 1024 : i32
    %10 = arith.muli %arg0, %c1024_i32 : i32
    %11 = arith.subi %9, %10 : i32
    %12 = vector.broadcast %11 : i32 to vector<8x128xi32>
    %13 = arith.cmpi slt, %8, %12 : vector<8x128xi32>
    %cst = arith.constant 12.5276299 : f32
    %14 = vector.broadcast %cst : f32 to vector<8x128xf32>
    %15 = arith.mulf %3, %14 : vector<8x128xf32>
    %cst_3 = arith.constant 0xFF800000 : f32
    %16 = vector.broadcast %cst_3 : f32 to vector<8x128xf32>
    %17 = arith.select %13, %15, %16 : vector<8x128xi1>, vector<8x128xf32>
    %c0_4 = arith.constant 0 : index
    %c0_5 = arith.constant 0 : index
    %18 = vector.load %arg6[%c0_4, %c0_5] : memref<1x1xf32, #tpu.memory_space<vmem>>, vector<1x1xf32>
    %19 = vector.shape_cast %17 : vector<8x128xf32> to vector<1x8x128xf32>
    %cst_6 = arith.constant dense<0xFF800000> : vector<1xf32>
    %20 = vector.multi_reduction <maximumf>, %19, %cst_6 [1, 2] : vector<1x8x128xf32> to vector<1xf32>
    %21 = vector.shape_cast %20 : vector<1xf32> to vector<1x1x1xf32>
    %22 = vector.extract %21[0, 0, 0] : f32 from vector<1x1x1xf32>
    %23 = vector.broadcast %22 : f32 to vector<1x1xf32>
    %24 = arith.maximumf %18, %23 : vector<1x1xf32>
    %25 = arith.subf %18, %24 : vector<1x1xf32>
    %26 = math.exp %25 : vector<1x1xf32>
    %27 = vector.broadcast %24 : vector<1x1xf32> to vector<8x128xf32>
    %28 = arith.subf %17, %27 : vector<8x128xf32>
    %29 = math.exp %28 : vector<8x128xf32>
    %cst_7 = arith.constant 0.000000e+00 : f32
    %30 = vector.broadcast %cst_7 : f32 to vector<8x128xf32>
    %31 = arith.select %13, %29, %30 : vector<8x128xi1>, vector<8x128xf32>
    %c0_8 = arith.constant 0 : index
    %c0_9 = arith.constant 0 : index
    %32 = vector.load %arg7[%c0_8, %c0_9] : memref<1x1xf32, #tpu.memory_space<vmem>>, vector<1x1xf32>
    %33 = arith.mulf %32, %26 : vector<1x1xf32>
    %34 = vector.shape_cast %31 : vector<8x128xf32> to vector<1x8x128xf32>
    %cst_10 = arith.constant dense<0.000000e+00> : vector<1xf32>
    %35 = vector.multi_reduction <add>, %34, %cst_10 [1, 2] : vector<1x8x128xf32> to vector<1xf32>
    %36 = vector.shape_cast %35 : vector<1xf32> to vector<1x1x1xf32>
    %37 = vector.extract %36[0, 0, 0] : f32 from vector<1x1x1xf32>
    %38 = vector.broadcast %37 : f32 to vector<1x1xf32>
    %39 = arith.addf %33, %38 : vector<1x1xf32>
    %c0_11 = arith.constant 0 : index
    %c0_12 = arith.constant 0 : index
    %40 = vector.load %arg7[%c0_11, %c0_12] : memref<1x1xf32, #tpu.memory_space<vmem>>, vector<1x1xf32>
    tpu.vector_store %arg7[%c0_11, %c0_12], %39 {strides = array<i32>} : memref<1x1xf32, #tpu.memory_space<vmem>>, vector<1x1xf32>,
    %c0_13 = arith.constant 0 : index
    %c0_14 = arith.constant 0 : index
    %41 = vector.load %arg8[%c0_13, %c0_14] : memref<1x1xf32, #tpu.memory_space<vmem>>, vector<1x1xf32>
    %42 = arith.mulf %41, %26 : vector<1x1xf32>
    %43 = arith.mulf %31, %3 : vector<8x128xf32>
    %44 = vector.shape_cast %43 : vector<8x128xf32> to vector<1x8x128xf32>
    %cst_15 = arith.constant dense<0.000000e+00> : vector<1xf32>
    %45 = vector.multi_reduction <add>, %44, %cst_15 [1, 2] : vector<1x8x128xf32> to vector<1xf32>
    %46 = vector.shape_cast %45 : vector<1xf32> to vector<1x1x1xf32>
    %47 = vector.extract %46[0, 0, 0] : f32 from vector<1x1x1xf32>
    %48 = vector.broadcast %47 : f32 to vector<1x1xf32>
    %49 = arith.addf %42, %48 : vector<1x1xf32>
    %c0_16 = arith.constant 0 : index
    %c0_17 = arith.constant 0 : index
    %50 = vector.load %arg8[%c0_16, %c0_17] : memref<1x1xf32, #tpu.memory_space<vmem>>, vector<1x1xf32>
    tpu.vector_store %arg8[%c0_16, %c0_17], %49 {strides = array<i32>} : memref<1x1xf32, #tpu.memory_space<vmem>>, vector<1x1xf32>,
    %c0_18 = arith.constant 0 : index
    %c0_19 = arith.constant 0 : index
    %51 = vector.load %arg6[%c0_18, %c0_19] : memref<1x1xf32, #tpu.memory_space<vmem>>, vector<1x1xf32>
    tpu.vector_store %arg6[%c0_18, %c0_19], %24 {strides = array<i32>} : memref<1x1xf32, #tpu.memory_space<vmem>>, vector<1x1xf32>,
    %c0_i32_20 = arith.constant 0 : i32
    %52 = arith.cmpi eq, %arg0, %c0_i32_20 : i32
    %53 = arith.extui %52 : i1 to i32
    %cst_21 = arith.constant 0xFF800000 : f32
    %c0_i32_22 = arith.constant 0 : i32
    %54 = arith.cmpi ne, %53, %c0_i32_22 : i32
    scf.if %54 {
      %c0_23 = arith.constant 0 : index
      %c0_24 = arith.constant 0 : index
      %55 = vector.load %arg8[%c0_23, %c0_24] : memref<1x1xf32, #tpu.memory_space<vmem>>, vector<1x1xf32>
      %c0_25 = arith.constant 0 : index
      %c0_26 = arith.constant 0 : index
      %56 = vector.load %arg7[%c0_25, %c0_26] : memref<1x1xf32, #tpu.memory_space<vmem>>, vector<1x1xf32>
      %57 = arith.divf %55, %56 : vector<1x1xf32>
      %c0_27 = arith.constant 0 : index
      %c0_28 = arith.constant 0 : index
      %58 = vector.load %arg3[%c0_27, %c0_28] : memref<8x128xf32, #tpu.memory_space<vmem>>, vector<8x128xf32>
      %59 = tpu.iota {dimensions = array<i32: 0>} : vector<8x128xi32>
      %c128_i32_29 = arith.constant 128 : i32
      %60 = vector.broadcast %c128_i32_29 : i32 to vector<8x128xi32>
      %61 = arith.muli %59, %60 : vector<8x128xi32>
      %62 = tpu.iota {dimensions = array<i32: 1>} : vector<8x128xi32>
      %63 = arith.addi %61, %62 : vector<8x128xi32>
      %c0_30 = arith.constant 0 : index
      %64 = memref.load %arg1[%c0_30] : memref<1xi32, #tpu.memory_space<smem>>
      %65 = vector.broadcast %64 : i32 to vector<8x128xi32>
      %66 = arith.cmpi slt, %63, %65 : vector<8x128xi32>
      %cst_31 = arith.constant 0.000000e+00 : f32
      %67 = vector.broadcast %cst_31 : f32 to vector<8x128xf32>
      %68 = arith.subf %67, %58 : vector<8x128xf32>
      %cst_32 = arith.constant 1.000000e+00 : f32
      %69 = vector.broadcast %cst_32 : f32 to vector<8x128xf32>
      %70 = arith.mulf %68, %69 : vector<8x128xf32>
      %71 = vector.broadcast %cst_21 : f32 to vector<8x128xf32>
      %72 = arith.select %66, %70, %71 : vector<8x128xi1>, vector<8x128xf32>
      %73 = vector.shape_cast %72 : vector<8x128xf32> to vector<1x8x128xf32>
      %cst_33 = arith.constant dense<0xFF800000> : vector<1xf32>
      %74 = vector.multi_reduction <maximumf>, %73, %cst_33 [1, 2] : vector<1x8x128xf32> to vector<1xf32>
      %75 = vector.shape_cast %74 : vector<1xf32> to vector<1x1x1xf32>
      %76 = vector.extract %75[0, 0, 0] : f32 from vector<1x1x1xf32>
      %77 = vector.broadcast %76 : f32 to vector<1x1xf32>
      %78 = vector.broadcast %77 : vector<1x1xf32> to vector<8x128xf32>
      %79 = arith.subf %72, %78 : vector<8x128xf32>
      %80 = math.exp %79 : vector<8x128xf32>
      %cst_34 = arith.constant 0.000000e+00 : f32
      %81 = vector.broadcast %cst_34 : f32 to vector<8x128xf32>
      %82 = arith.select %66, %80, %81 : vector<8x128xi1>, vector<8x128xf32>
      %83 = arith.mulf %82, %58 : vector<8x128xf32>
      %84 = vector.shape_cast %83 : vector<8x128xf32> to vector<1x8x128xf32>
      %cst_35 = arith.constant dense<0.000000e+00> : vector<1xf32>
      %85 = vector.multi_reduction <add>, %84, %cst_35 [1, 2] : vector<1x8x128xf32> to vector<1xf32>
      %86 = vector.shape_cast %85 : vector<1xf32> to vector<1x1x1xf32>
      %87 = vector.extract %86[0, 0, 0] : f32 from vector<1x1x1xf32>
      %88 = vector.broadcast %87 : f32 to vector<1x1xf32>
      %89 = vector.shape_cast %82 : vector<8x128xf32> to vector<1x8x128xf32>
      %cst_36 = arith.constant dense<0.000000e+00> : vector<1xf32>
      %90 = vector.multi_reduction <add>, %89, %cst_36 [1, 2] : vector<1x8x128xf32> to vector<1xf32>
      %91 = vector.shape_cast %90 : vector<1xf32> to vector<1x1x1xf32>
      %92 = vector.extract %91[0, 0, 0] : f32 from vector<1x1x1xf32>
      %93 = vector.broadcast %92 : f32 to vector<1x1xf32>
      %94 = arith.divf %88, %93 : vector<1x1xf32>
      %95 = arith.subf %57, %94 : vector<1x1xf32>
      %cst_37 = arith.constant 5.000000e-01 : f32
      %96 = vector.broadcast %cst_37 : f32 to vector<1x1xf32>
      %97 = arith.addf %95, %96 : vector<1x1xf32>
      %cst_38 = arith.constant 6.000000e+00 : f32
      %98 = vector.broadcast %cst_38 : f32 to vector<1x1xf32>
      %99 = arith.mulf %98, %97 : vector<1x1xf32>
      %100 = math.exp %99 : vector<1x1xf32>
      %cst_39 = arith.constant 1.000000e+00 : f32
      %101 = vector.broadcast %cst_39 : f32 to vector<1x1xf32>
      %102 = arith.addf %101, %100 : vector<1x1xf32>
      %103 = math.log %102 : vector<1x1xf32>
      %cst_40 = arith.constant 0.666666686 : f32
      %104 = vector.broadcast %cst_40 : f32 to vector<1x1xf32>
      %105 = arith.mulf %104, %103 : vector<1x1xf32>
      %c0_41 = arith.constant 0 : index
      %c0_42 = arith.constant 0 : index
      %106 = vector.load %arg5[%c0_41, %c0_42] : memref<1x1xf32, #tpu.memory_space<vmem>>, vector<1x1xf32>
      tpu.vector_store %arg5[%c0_41, %c0_42], %105 {strides = array<i32>} : memref<1x1xf32, #tpu.memory_space<vmem>>, vector<1x1xf32>,
    } else {
    }
    return
  }
  func.func @transform_0(%arg0: i32, %arg1: memref<1xi32, #tpu.memory_space<smem>>, %arg2: memref<1xi32, #tpu.memory_space<smem>>) -> (i32, i32) {
    %c0_i32 = arith.constant 0 : i32
    %c0_i32_0 = arith.constant 0 : i32
    %c0_i32_1 = arith.constant 0 : i32
    return %c0_i32, %c0_i32_0 : i32, i32
  }
  func.func @transform_1(%arg0: i32, %arg1: memref<1xi32, #tpu.memory_space<smem>>, %arg2: memref<1xi32, #tpu.memory_space<smem>>) -> (i32, i32) {
    %c0_i32 = arith.constant 0 : i32
    %c0_i32_0 = arith.constant 0 : i32
    return %arg0, %c0_i32 : i32, i32
  }
  func.func @transform_2(%arg0: i32, %arg1: memref<1xi32, #tpu.memory_space<smem>>, %arg2: memref<1xi32, #tpu.memory_space<smem>>) -> (i32, i32) {
    %c0_i32 = arith.constant 0 : i32
    %c0_i32_0 = arith.constant 0 : i32
    %c0_i32_1 = arith.constant 0 : i32
    return %c0_i32, %c0_i32_0 : i32, i32
  }
}

</mosaic_0001>

<bundles_post_ra>
// kernel: tpu_custom_call.1
= control target key start
LH: loop header
LB: loop body
LE: loop exit
PB: predicated region body
PF: predicated region fallthrough
CT: control target
= control target key end

     0   :  { %11 = vsyncpa [#allocation9], 0  ;;  %s350_s0 = inlined_call_operand.<no memory space> [shape: s32[1], index: 0, kind: input, shape index: {}]   ;;  %s351_s1 = inlined_call_operand.<no memory space> [shape: s32[1], index: 1, kind: input, shape index: {}]   ;;  %s352_s2 = inlined_call_operand.hbm [shape: f32[8,128], index: 2, kind: input, shape index: {}]   ;;  %s353_s3 = inlined_call_operand.vmem [shape: f32[8,128], index: 3, kind: input, shape index: {}]   ;;  %s354_s4 = inlined_call_operand.hbm [shape: f32[1,1], index: 4, kind: output, shape index: {}]  }
   0x1   :  { %12 = vsyncpa [#allocation10], 0  ;;  %s264_s15 = smov [#allocation8]   ;;  %s216_s19 = scalar_lea.hbm %s352_s2, 128 }
   0x2   :  { %s19_s16 = sshll.u32 %s264_s15, 4  ;;  %p217_p0 = scmp.ne.s32.totalorder %s352_s2, %s216_s19  ;;  %s20_s16 = int_to_ptr.vmem [resolvable:$true] %s19_s16 }
   0x3   :  { %p220_p1 = scmp.lt.u32.totalorder %s216_s19, %s352_s2 }
   0x5   :  { %p222_p2 = pnand %p220_p1, %p217_p0 }
   0x7   :  { %225 = shalt.err (!%p222_p2)
}
   0x8   :  { %s226_s24 = scalar_lea.vmem %s20_s16, 128  ;;  %p231_p4 = scmp.lt.s32.totalorder %s20_s16, %s20_s16 }
   0x9   :  { %p227_p3 = scmp.ne.s32.totalorder %s20_s16, %s226_s24  ;;  %p232_p5 = scmp.lt.s32.totalorder %s226_s24, %s226_s24 }
   0xb   :  { %p233_p6 = por %p232_p5, %p231_p4 }
   0xd   :  { %p234_p7 = pnand %p233_p6, %p227_p3 }
   0xf   :  { %237 = shalt.err (!%p234_p7)
}
  0x10   :  { %22 = dma.hbm_to_vmem [thread:$0]  %s352_s2, 128, %s20_s16, [#allocation9]  }
  0x11   :  { %260 = dma.done.wait [#allocation9], 128  }
  0x12   :  { %261 = vsyncadd [#allocation9], 4294967168  ;;  %v37_v0 = vlaneseq  ;;  %v46_v4 = vstv %s351_s1  ;;  %v36_v6 = vld [vmem:[%s353_s3] sm:$0xff]  ;;  %vm32_vm1 = vcmask 0   ;;  %v265_v10 = vmov -inf   ;;  %s268_s9 = smov [#allocation11]  }
  0x13   :  { %v48_v8 = vmul.f32 12.52763, %v36_v6  ;;  %33 = vst.msk [vmem:[#allocation2] sm:$0x1] %vm32_vm1, %v265_v10  ;;  %v266_v11 = vmov 0   ;;  %v267_v12 = vmov 0.0   ;;  %v118_v32 = vstv %s350_s0 }
  0x14   :  { %v38_v1 = vshrl.u32 %v37_v0, 7  ;;  %v41_v2 = vand.u32 127, %v37_v0  ;;  %201 = vset.pattern.permute.xlu0 %v266_v11  ;;  %34 = vst.msk [vmem:[#allocation3] sm:$0x1] %vm32_vm1, %v267_v12  ;;  %35 = vst.msk [vmem:[#allocation4] sm:$0x1] %vm32_vm1, %v267_v12 }
  0x15   :  { %v116_v30 = vld [vmem:[#allocation8] sm:$0xff]  ;;  %s175_s10 = sshll.u32 %s268_s9, 4  ;;  %s176_s10 = int_to_ptr.vmem [resolvable:$true] %s175_s10 }
  0x16   :  { %v39_v3 = vmul.u32 128, %v38_v1  ;;  %v68_v21 = vsub.s32 0, %v38_v1  ;;  %v120_v33 = vsub.f32 0.0, %v116_v30  ;;  %s238_s11 = scalar_lea.vmem %s176_s10, 16  ;;  %s242_s12 = scalar_lea.vmem %s176_s10, 32 }
  0x17   :  { %p239_p8 = scmp.ne.s32.totalorder %s176_s10, %s238_s11  ;;  %p243_p9 = scmp.lt.s32.totalorder %s176_s10, %s176_s10 }
  0x18   :  { %v42_v5 = vadd.s32 %v41_v2, %v39_v3  ;;  %p244_p10 = scmp.lt.s32.totalorder %s242_s12, %s238_s11 }
  0x1a   :  { %vm312_vm0 = vcmp.lt.s32.totalorder %v42_v5, %v46_v4  ;;  %v50_v20 = vld [vmem:[#allocation2] sm:$0x1]  ;;  %vm327_vm2 = vcmp.lt.s32.totalorder %v42_v5, %v118_v32  ;;  %p245_p11 = por %p244_p10, %p243_p9 }
  0x1b   :  { %v49_v9 = vsel %vm312_vm0, %v48_v8, -inf  ;;  %v121_v36 = vsel %vm327_vm2, %v120_v33, -inf  ;;  %v78_v60 = vld [vmem:[#allocation3] sm:$0x1]  ;;  %v93_v63 = vld [vmem:[#allocation4] sm:$0x1] }
  0x1c   :  { %51 = vmax.xlane.f32.xlu0 %v49_v9  ;;  %p246_p12 = pnand %p245_p11, %p239_p8 }
  0xa9   :  { %v52_v13 = vpop.xlane.xlu0 %51 }
  0xaa   :  { %v53_v14 = vrot.slane %v52_v13, 4 }
  0xac   :  { %v54_v15 = vmax.f32 %v52_v13, %v53_v14 }
  0xae   :  { %v55_v16 = vrot.slane %v54_v15, 2 }
  0xb0   :  { %v56_v17 = vmax.f32 %v54_v15, %v55_v16 }
  0xb2   :  { %v57_v18 = vrot.slane %v56_v17, 1 }
  0xb4   :  { %v58_v19 = vmax.f32 %v56_v17, %v57_v18 }
  0xb6   :  { %184 = vpush %v58_v19 }
  0xe7   :  { %s185_s1 = spop %184 }
  0xe8   :  { %v60_v22 = vstv %s185_s1 }
  0xe9   :  { %v61_v23 = vmax.f32 %v50_v20, %v60_v22 }
  0xeb   :  { %v62_v24 = vsub.f32 %v50_v20, %v61_v23  ;;  %108 = vst.msk [vmem:[#allocation2] sm:$0x1] %vm32_vm1, %v61_v23  ;;  %v69_v25 = vrot.slane %v61_v23, %v68_v21 }
  0xed   :  { %71 = vperm.xlu0 %201, %v69_v25   ;;  %v63_v58 = vmul.f32 1.442695, %v62_v24 }
 0x16c   :  { %v72_v26 = vpop.permute.xlu0 %71 }
 0x16d   :  { %v74_v27 = vsub.f32 %v49_v9, %v72_v26 }
 0x16f   :  { %v75_v28 = vmul.f32 1.442695, %v74_v27 }
 0x171   :  { %202 = vpow2.f32 %v75_v28 }
 0x172   :  { %204 = vpow2.f32 %v63_v58 }
 0x17b   :  { %v203_v29 = vpop.eup %202 }
 0x17c   :  { %v77_v31 = vsel %vm312_vm0, %v203_v29, 0.0  ;;  %v205_v59 = vpop.eup %204 }
 0x17d   :  { %80 = vadd.xlane.f32.xlu1 %v77_v31  ;;  %v95_v34 = vmul.f32 %v77_v31, %v36_v6  ;;  %v79_v61 = vmul.f32 %v205_v59, %v78_v60  ;;  %v94_v1 = vmul.f32 %v205_v59, %v93_v63 }
 0x181   :  { %96 = vadd.xlane.f32.xlu1 %v95_v34 }
 0x185   :  { %122 = vmax.xlane.f32.xlu1 %v121_v36 }
 0x20a   :  { %v81_v37 = vpop.xlane.xlu1 %80 }
 0x20b   :  { %v82_v38 = vrot.slane %v81_v37, 4 }
 0x20d   :  { %v83_v39 = vadd.f32 %v82_v38, %v81_v37 }
 0x20e   :  { %v97_v40 = vpop.xlane.xlu1 %96 }
 0x20f   :  { %v84_v41 = vrot.slane %v83_v39, 2  ;;  %v98_v42 = vrot.slane %v97_v40, 4 }
 0x211   :  { %v99_v43 = vadd.f32 %v98_v42, %v97_v40  ;;  %v85_v44 = vadd.f32 %v84_v41, %v83_v39 }
 0x212   :  { %v123_v45 = vpop.xlane.xlu1 %122 }
 0x213   :  { %v100_v46 = vrot.slane %v99_v43, 2  ;;  %v124_v47 = vrot.slane %v123_v45, 4  ;;  %v86_v48 = vrot.slane %v85_v44, 1 }
 0x215   :  { %v125_v49 = vmax.f32 %v123_v45, %v124_v47  ;;  %v87_v50 = vadd.f32 %v86_v48, %v85_v44  ;;  %v101_v51 = vadd.f32 %v100_v46, %v99_v43 }
 0x217   :  { %v126_v52 = vrot.slane %v125_v49, 2  ;;  %186 = vpush %v87_v50  ;;  %v102_v53 = vrot.slane %v101_v51, 1 }
 0x219   :  { %v103_v54 = vadd.f32 %v102_v53, %v101_v51  ;;  %v127_v55 = vmax.f32 %v125_v49, %v126_v52 }
 0x21b   :  { %188 = vpush %v103_v54  ;;  %v128_v56 = vrot.slane %v127_v55, 1 }
 0x21d   :  { %v129_v57 = vmax.f32 %v127_v55, %v128_v56 }
 0x21f   :  { %190 = vpush %v129_v57 }
 0x248   :  { %s187_s0 = spop %186 }
 0x249   :  { %v89_v62 = vstv %s187_s0 }
 0x24a   :  { %v90_v0 = vadd.f32 %v89_v62, %v79_v61 }
 0x24c   :  { %92 = vst.msk [vmem:[#allocation3] sm:$0x1] %vm32_vm1, %v90_v0  ;;  %s189_s5 = spop %188 }
 0x24d   :  { %v105_v2 = vstv %s189_s5 }
 0x24e   :  { %v106_v3 = vadd.f32 %v105_v2, %v94_v1 }
 0x250   :  { %107 = vst.msk [vmem:[#allocation4] sm:$0x1] %vm32_vm1, %v106_v3  ;;  %s191_s6 = spop %190 }
 0x251   :  { %v131_v4 = vstv %s191_s6 }
 0x252   :  { %v132_v5 = vsub.f32 %v121_v36, %v131_v4 }
 0x253   :  { %v113_v24 = vld [vmem:[#allocation3] sm:$0x1] }
 0x254   :  { %v133_v6 = vmul.f32 1.442695, %v132_v5 }
 0x256   :  { %206 = vpow2.f32 %v133_v6 }
 0x257   :  { %208 = vrcp.f32 %v113_v24  ;;  %v112_v29 = vld [vmem:[#allocation4] sm:$0x1] }
 0x260   :  { %v207_v7 = vpop.eup %206 }
 0x261   :  { %v135_v8 = vsel %vm327_vm2, %v207_v7, 0.0  ;;  %v209_v26 = vpop.eup %208 }
 0x262   :  { %v136_v9 = vmul.f32 %v135_v8, %v116_v30  ;;  %v115_v30 = vmul.f32 %v209_v26, %v112_v29 }
 0x264   :  { %137 = vadd.xlane.f32.xlu1 %v136_v9 }
 0x268   :  { %147 = vadd.xlane.f32.xlu1 %v135_v8 }
 0x2f1   :  { %v138_v10 = vpop.xlane.xlu1 %137 }
 0x2f2   :  { %v139_v11 = vrot.slane %v138_v10, 4 }
 0x2f4   :  { %v140_v12 = vadd.f32 %v139_v11, %v138_v10 }
 0x2f5   :  { %v148_v13 = vpop.xlane.xlu1 %147 }
 0x2f6   :  { %v141_v14 = vrot.slane %v140_v12, 2  ;;  %v149_v15 = vrot.slane %v148_v13, 4 }
 0x2f8   :  { %v150_v16 = vadd.f32 %v149_v15, %v148_v13  ;;  %v142_v17 = vadd.f32 %v141_v14, %v140_v12 }
 0x2fa   :  { %v151_v18 = vrot.slane %v150_v16, 2  ;;  %v143_v19 = vrot.slane %v142_v17, 1 }
 0x2fc   :  { %v152_v20 = vadd.f32 %v151_v18, %v150_v16  ;;  %v144_v21 = vadd.f32 %v143_v19, %v142_v17 }
 0x2fe   :  { %192 = vpush %v144_v21  ;;  %v153_v22 = vrot.slane %v152_v20, 1 }
 0x300   :  { %v154_v23 = vadd.f32 %v153_v22, %v152_v20 }
 0x302   :  { %194 = vpush %v154_v23 }
 0x32f   :  { %s193_s7 = spop %192 }
 0x330   :  { %v146_v28 = vstv %s193_s7 }
 0x333   :  { %s195_s8 = spop %194 }
 0x334   :  { %v156_v25 = vstv %s195_s8 }
 0x335   :  { %210 = vrcp.f32 %v156_v25 }
 0x33f   :  { %v211_v27 = vpop.eup %210 }
 0x340   :  { %v158_v31 = vmul.f32 %v211_v27, %v146_v28 }
 0x342   :  { %v159_v32 = vsub.f32 %v115_v30, %v158_v31 }
 0x344   :  { %v160_v33 = vadd.f32 0.5, %v159_v32 }
 0x346   :  { %v161_v34 = vmul.f32 6.0, %v160_v33 }
 0x348   :  { %v162_v35 = vmul.f32 1.442695, %v161_v34 }
 0x34a   :  { %212 = vpow2.f32 %v162_v35 }
 0x354   :  { %v213_v36 = vpop.eup %212 }
 0x355   :  { %v164_v37 = vadd.f32 1.0, %v213_v36 }
 0x357   :  { %214 = vlog2.f32 %v164_v37 }
 0x361   :  { %v215_v38 = vpop.eup %214 }
 0x362   :  { %v166_v39 = vmul.f32 0.6931472, %v215_v38 }
 0x364   :  { %v167_v40 = vmul.f32 0.6666667, %v166_v39 }
 0x366   :  { %168 = vst.msk [vmem:[#allocation11] sm:$0x1] %vm32_vm1, %v167_v40 }
 0x367   :  { %249 = shalt.err (!%p246_p12)
}
 0x368   :  { %s250_s15 = scalar_lea.hbm %s354_s4, 16 }
 0x369   :  { %p251_p13 = scmp.ne.s32.totalorder %s354_s4, %s250_s15  ;;  %p254_p0 = scmp.lt.u32.totalorder %s250_s15, %s354_s4 }
 0x36b   :  { %p256_p1 = pnand %p254_p0, %p251_p13 }
 0x36d   :  { %259 = shalt.err (!%p256_p1)
}
 0x36e   :  { %178 = dma.vmem_to_hbm [thread:$0]  %s176_s10, 16, %s354_s4, [#allocation10]  }
 0x36f   :  { %262 = dma.done.wait [#allocation10], 16  }
 0x370   :  { %263 = vsyncadd [#allocation10], 4294967280 }
 0x371   :  { %182 = vsyncpa [#allocation9], 1 }
 0x372   :  { %183 = vsyncpa [#allocation10], 1 }

</bundles_post_ra>
